<compile_context>
chip_gen: v7x
topology: tpu7x:2x2x1
jax: 0.10.0
libtpu: 0.0.40
codegen_flags: <defaults>
</compile_context>

<pallas_src>
import functools

import jax
import jax.numpy as jnp
from jax.experimental import pallas as pl
from jax.experimental.pallas import tpu as pltpu


def _round_up(x: int, m: int) -> int:
    return ((x + m - 1) // m) * m


def _encoder_kernel(x_ref, w1_ref, b1_ref, w2_ref, b2_ref, wh_ref, bh_ref, out_ref):
    cdt = w1_ref.dtype  # MXU operand dtype (bf16 by default, f32 for exact path)
    # layer 1: Linear(in_dim, hidden) + tanh  (f32 accumulate, f32 bias/tanh)
    h = jnp.tanh(
        jnp.dot(x_ref[...].astype(cdt), w1_ref[...],
                preferred_element_type=jnp.float32)
        + b1_ref[...]
    )
    # layer 2: Linear(hidden, hidden) + tanh
    h = jnp.tanh(
        jnp.dot(h.astype(cdt), w2_ref[...], preferred_element_type=jnp.float32)
        + b2_ref[...]
    )
    # fused latent heads: (tm, 2*latent) store (un-padded; tiny writeback)
    out_ref[...] = (
        jnp.dot(h.astype(cdt), wh_ref[...], preferred_element_type=jnp.float32)
        + bh_ref[...]
    ).astype(out_ref.dtype)


def prepare_params(params, compute_dtype=jnp.bfloat16):
    """One-time, per-model weight preprocessing (hoisted out of the call path).

    Concats the two latent heads and casts MXU operands to `compute_dtype`
    (biases stay f32 because bias-add/tanh run in f32 inside the kernel).
    """
    wh = jnp.concatenate([params["w11"], params["w12"]], axis=1)
    bh = jnp.concatenate([params["b11"], params["b12"]], axis=1)
    return {
        "w1": params["w1"].astype(compute_dtype),
        "b1": params["b1"].astype(jnp.float32),
        "w2": params["w2"].astype(compute_dtype),
        "b2": params["b2"].astype(jnp.float32),
        "wh": wh.astype(compute_dtype),
        "bh": bh.astype(jnp.float32),
    }


@functools.partial(jax.jit, static_argnames=("block_m", "softplus_out"))
def fc_encoder_forward(x, kparams, *, block_m=1024, softplus_out=False):
    """x: (B, ...) any float dtype (bf16 halves input DMA). kparams: prepare_params().

    Returns (mu, log_sigma), each (B, latent_dim) float32.
    """
    B = x.shape[0]
    x_flat = x.reshape(B, -1)            # same as torch x.view(-1, in_dim)
    in_dim = x_flat.shape[1]
    n_out = kparams["wh"].shape[1]       # 2 * latent_dim
    latent = n_out // 2

    # --- batch tiling ------------------------------------------------------
    # Aim for >=2 parallel tiles (both TensorCores on v7x), sublane-aligned.
    x_dsize = x_flat.dtype.itemsize
    tm = min(block_m, max(8, _round_up(-(-B // 2), 32)))
    if tm >= B:
        tm = B                            # single tile; block == full array dim
    # keep the double-buffered x tile well inside scoped VMEM
    while tm > 8 and 2 * tm * in_dim * x_dsize > (24 << 20):
        tm = max(8, _round_up(tm // 2, 8))
    grid = (pl.cdiv(B, tm),)              # ragged last tile: OOB rows masked on store

    w_bytes = sum(int(v.size) * v.dtype.itemsize for v in kparams.values())
    vmem_need = (2 * tm * in_dim * x_dsize      # double-buffered x tile
                 + 2 * tm * n_out * 4           # double-buffered output tile
                 + w_bytes + (2 << 20))
    vmem_limit = int(min(max(vmem_need, 32 << 20), 64 << 20))

    def _resident(shape):
        # Constant index_map -> block stays VMEM-resident across grid steps.
        return pl.BlockSpec(shape, lambda i, _s=shape: (0,) * len(_s))

    out = pl.pallas_call(
        _encoder_kernel,
        out_shape=jax.ShapeDtypeStruct((B, n_out), jnp.float32),
        grid_spec=pl.GridSpec(
            grid=grid,
            in_specs=[
                pl.BlockSpec((tm, in_dim), lambda i: (i, 0)),   # x tile (pipelined)
                _resident(kparams["w1"].shape),
                _resident(kparams["b1"].shape),
                _resident(kparams["w2"].shape),
                _resident(kparams["b2"].shape),
                _resident(kparams["wh"].shape),
                _resident(kparams["bh"].shape),
            ],
            out_specs=pl.BlockSpec((tm, n_out), lambda i: (i, 0)),
        ),
        compiler_params=pltpu.CompilerParams(
            dimension_semantics=("parallel",),   # independent batch tiles
            vmem_limit_bytes=vmem_limit,
        ),
    )(x_flat, kparams["w1"], kparams["b1"], kparams["w2"], kparams["b2"],
      kparams["wh"], kparams["bh"])

    mu = out[:, :latent]
    log_sigma = out[:, latent:]
    if softplus_out:
        log_sigma = jax.nn.softplus(log_sigma)
    return mu, log_sigma


def init_params(key, in_dim, hidden_dim=128, latent_dim=2):
    """Deterministic synthetic init. Weights stored as (in_features, out_features)."""
    ks = jax.random.split(key, 8)

    def lin(kw, kb, fan_in, fan_out):
        bound = 1.0 / jnp.sqrt(jnp.float32(fan_in))
        w = jax.random.uniform(kw, (fan_in, fan_out), jnp.float32, -bound, bound)
        b = jax.random.uniform(kb, (1, fan_out), jnp.float32, -bound, bound)
        return w, b

    w1, b1 = lin(ks[0], ks[1], in_dim, hidden_dim)
    w2, b2 = lin(ks[2], ks[3], hidden_dim, hidden_dim)
    w11, b11 = lin(ks[4], ks[5], hidden_dim, latent_dim)
    w12, b12 = lin(ks[6], ks[7], hidden_dim, latent_dim)
    return {
        "w1": w1, "b1": b1,
        "w2": w2, "b2": b2,
        "w11": w11, "b11": b11,
        "w12": w12, "b12": b12,
    }


def _reference_forward(x, params, softplus_out=False):
    """Pure-JAX f32 reference with identical semantics (correctness check)."""
    B = x.shape[0]
    xf = x.reshape(B, -1).astype(jnp.float32)
    h = jnp.tanh(xf @ params["w1"] + params["b1"])
    h = jnp.tanh(h @ params["w2"] + params["b2"])
    mu = h @ params["w11"] + params["b11"]
    log_sigma = h @ params["w12"] + params["b12"]
    if softplus_out:
        log_sigma = jax.nn.softplus(log_sigma)
    return mu, log_sigma


if __name__ == "__main__":
    key = jax.random.PRNGKey(0)
    k_x, k_p, k_x2 = jax.random.split(key, 3)

    B, H, W = 8, 16, 16                  # in_dim = (16, 16) -> flattened 256
    hidden_dim, latent_dim = 128, 2

    x = jax.random.normal(k_x, (B, H, W), dtype=jnp.float32)
    params = init_params(k_p, H * W, hidden_dim, latent_dim)
    mu_ref, ls_ref = _reference_forward(x, params)

    # f32 operand path: exact PyTorch semantics.
    kp_f32 = prepare_params(params, compute_dtype=jnp.float32)
    mu, log_sigma = fc_encoder_forward(x, kp_f32)
    jax.block_until_ready((mu, log_sigma))
    assert mu.shape == (B, latent_dim) and log_sigma.shape == (B, latent_dim)
    assert jnp.allclose(mu, mu_ref, atol=1e-5, rtol=1e-5)
    assert jnp.allclose(log_sigma, ls_ref, atol=1e-5, rtol=1e-5)

    # Default bf16-operand path (f32 accumulate, f32 bias/tanh): looser tolerance.
    kp_bf16 = prepare_params(params)
    mu_bf, ls_bf = fc_encoder_forward(x, kp_bf16)
    jax.block_until_ready((mu_bf, ls_bf))
    assert jnp.allclose(mu_bf, mu_ref, atol=5e-2, rtol=5e-2)
    assert jnp.allclose(ls_bf, ls_ref, atol=5e-2, rtol=5e-2)

    # Larger, non-divisible batch: exercises the ragged last tile, two parallel
    # batch tiles, and bf16 x storage (half the input DMA bytes).
    B2 = 600
    x2 = jax.random.normal(k_x2, (B2, H, W), dtype=jnp.float32)
    mu2, ls2 = fc_encoder_forward(x2.astype(jnp.bfloat16), kp_bf16, block_m=512)
    jax.block_until_ready((mu2, ls2))
    mu2_ref, ls2_ref = _reference_forward(x2, params)
    assert mu2.shape == (B2, latent_dim) and ls2.shape == (B2, latent_dim)
    assert jnp.allclose(mu2, mu2_ref, atol=7e-2, rtol=7e-2)
    assert jnp.allclose(ls2, ls2_ref, atol=7e-2, rtol=7e-2)

    print("KERNEL_OK")
</pallas_src>

<mosaic_0001>
module attributes {stable_mosaic.version = 11 : i64} {
  func.func @_encoder_kernel(%arg0: i32, %arg1: memref<8x256xf32, #tpu.memory_space<vmem>>, %arg2: memref<256x128xf32, #tpu.memory_space<vmem>>, %arg3: memref<1x128xf32, #tpu.memory_space<vmem>>, %arg4: memref<128x128xf32, #tpu.memory_space<vmem>>, %arg5: memref<1x128xf32, #tpu.memory_space<vmem>>, %arg6: memref<128x4xf32, #tpu.memory_space<vmem>>, %arg7: memref<1x4xf32, #tpu.memory_space<vmem>>, %arg8: memref<8x4xf32, #tpu.memory_space<vmem>>) attributes {dimension_semantics = [#tpu.dimension_semantics<parallel>], iteration_bounds = array<i64: 1>, scalar_prefetch = 0 : i64, scratch_operands = 0 : i64, tpu.core_type = #tpu.core_type<tc>, window_params = [{transform_indices = @transform_0, window_bounds = array<i64: 8, 256>}, {pipeline_mode = #tpu.pipeline_mode<synchronous>, transform_indices = @transform_1, window_bounds = array<i64: 256, 128>}, {pipeline_mode = #tpu.pipeline_mode<synchronous>, transform_indices = @transform_2, window_bounds = array<i64: 1, 128>}, {pipeline_mode = #tpu.pipeline_mode<synchronous>, transform_indices = @transform_3, window_bounds = array<i64: 128, 128>}, {pipeline_mode = #tpu.pipeline_mode<synchronous>, transform_indices = @transform_4, window_bounds = array<i64: 1, 128>}, {pipeline_mode = #tpu.pipeline_mode<synchronous>, transform_indices = @transform_5, window_bounds = array<i64: 128, 4>}, {pipeline_mode = #tpu.pipeline_mode<synchronous>, transform_indices = @transform_6, window_bounds = array<i64: 1, 4>}, {transform_indices = @transform_7, window_bounds = array<i64: 8, 4>}]} {
    %c0 = arith.constant 0 : index
    %c0_0 = arith.constant 0 : index
    %0 = vector.load %arg1[%c0, %c0_0] : memref<8x256xf32, #tpu.memory_space<vmem>>, vector<8x256xf32>
    %c0_1 = arith.constant 0 : index
    %c0_2 = arith.constant 0 : index
    %1 = vector.load %arg2[%c0_1, %c0_2] : memref<256x128xf32, #tpu.memory_space<vmem>>, vector<256x128xf32>
    %cst = arith.constant dense<0.000000e+00> : vector<8x128xf32>
    %2 = tpu.matmul %0, %1, %cst {dimension_numbers = #tpu.dot_dimension_numbers<[1], [0], [0], [1], [0, 0, 1, 1], [], []>} : vector<8x256xf32>, vector<256x128xf32>, vector<8x128xf32> -> vector<8x128xf32>
    %c0_3 = arith.constant 0 : index
    %c0_4 = arith.constant 0 : index
    %3 = vector.load %arg3[%c0_3, %c0_4] : memref<1x128xf32, #tpu.memory_space<vmem>>, vector<1x128xf32>
    %4 = vector.broadcast %3 : vector<1x128xf32> to vector<8x128xf32>
    %5 = arith.addf %2, %4 : vector<8x128xf32>
    %6 = math.tanh %5 : vector<8x128xf32>
    %c0_5 = arith.constant 0 : index
    %c0_6 = arith.constant 0 : index
    %7 = vector.load %arg4[%c0_5, %c0_6] : memref<128x128xf32, #tpu.memory_space<vmem>>, vector<128x128xf32>
    %cst_7 = arith.constant dense<0.000000e+00> : vector<8x128xf32>
    %8 = tpu.matmul %6, %7, %cst_7 {dimension_numbers = #tpu.dot_dimension_numbers<[1], [0], [0], [1], [0, 0, 1, 1], [], []>} : vector<8x128xf32>, vector<128x128xf32>, vector<8x128xf32> -> vector<8x128xf32>
    %c0_8 = arith.constant 0 : index
    %c0_9 = arith.constant 0 : index
    %9 = vector.load %arg5[%c0_8, %c0_9] : memref<1x128xf32, #tpu.memory_space<vmem>>, vector<1x128xf32>
    %10 = vector.broadcast %9 : vector<1x128xf32> to vector<8x128xf32>
    %11 = arith.addf %8, %10 : vector<8x128xf32>
    %12 = math.tanh %11 : vector<8x128xf32>
    %c0_10 = arith.constant 0 : index
    %c0_11 = arith.constant 0 : index
    %13 = vector.load %arg6[%c0_10, %c0_11] : memref<128x4xf32, #tpu.memory_space<vmem>>, vector<128x4xf32>
    %cst_12 = arith.constant dense<0.000000e+00> : vector<8x4xf32>
    %14 = tpu.matmul %12, %13, %cst_12 {dimension_numbers = #tpu.dot_dimension_numbers<[1], [0], [0], [1], [0, 0, 1, 1], [], []>} : vector<8x128xf32>, vector<128x4xf32>, vector<8x4xf32> -> vector<8x4xf32>
    %c0_13 = arith.constant 0 : index
    %c0_14 = arith.constant 0 : index
    %15 = vector.load %arg7[%c0_13, %c0_14] : memref<1x4xf32, #tpu.memory_space<vmem>>, vector<1x4xf32>
    %16 = vector.broadcast %15 : vector<1x4xf32> to vector<8x4xf32>
    %17 = arith.addf %14, %16 : vector<8x4xf32>
    %c0_15 = arith.constant 0 : index
    %c0_16 = arith.constant 0 : index
    %18 = vector.load %arg8[%c0_15, %c0_16] : memref<8x4xf32, #tpu.memory_space<vmem>>, vector<8x4xf32>
    tpu.vector_store %arg8[%c0_15, %c0_16], %17 {strides = array<i32>} : memref<8x4xf32, #tpu.memory_space<vmem>>, vector<8x4xf32>,
    return
  }
  func.func @transform_0(%arg0: i32) -> (i32, i32) {
    %c0_i32 = arith.constant 0 : i32
    %c0_i32_0 = arith.constant 0 : i32
    return %arg0, %c0_i32 : i32, i32
  }
  func.func @transform_1(%arg0: i32) -> (i32, i32) {
    %c0_i32 = arith.constant 0 : i32
    %c0_i32_0 = arith.constant 0 : i32
    %c0_i32_1 = arith.constant 0 : i32
    return %c0_i32, %c0_i32_0 : i32, i32
  }
  func.func @transform_2(%arg0: i32) -> (i32, i32) {
    %c0_i32 = arith.constant 0 : i32
    %c0_i32_0 = arith.constant 0 : i32
    %c0_i32_1 = arith.constant 0 : i32
    return %c0_i32, %c0_i32_0 : i32, i32
  }
  func.func @transform_3(%arg0: i32) -> (i32, i32) {
    %c0_i32 = arith.constant 0 : i32
    %c0_i32_0 = arith.constant 0 : i32
    %c0_i32_1 = arith.constant 0 : i32
    return %c0_i32, %c0_i32_0 : i32, i32
  }
  func.func @transform_4(%arg0: i32) -> (i32, i32) {
    %c0_i32 = arith.constant 0 : i32
    %c0_i32_0 = arith.constant 0 : i32
    %c0_i32_1 = arith.constant 0 : i32
    return %c0_i32, %c0_i32_0 : i32, i32
  }
  func.func @transform_5(%arg0: i32) -> (i32, i32) {
    %c0_i32 = arith.constant 0 : i32
    %c0_i32_0 = arith.constant 0 : i32
    %c0_i32_1 = arith.constant 0 : i32
    return %c0_i32, %c0_i32_0 : i32, i32
  }
  func.func @transform_6(%arg0: i32) -> (i32, i32) {
    %c0_i32 = arith.constant 0 : i32
    %c0_i32_0 = arith.constant 0 : i32
    %c0_i32_1 = arith.constant 0 : i32
    return %c0_i32, %c0_i32_0 : i32, i32
  }
  func.func @transform_7(%arg0: i32) -> (i32, i32) {
    %c0_i32 = arith.constant 0 : i32
    %c0_i32_0 = arith.constant 0 : i32
    return %arg0, %c0_i32 : i32, i32
  }
}

</mosaic_0001>

<bundles_post_ra>
// kernel: fc_encoder_forward.1
= control target key start
LH: loop header
LB: loop body
LE: loop exit
PB: predicated region body
PF: predicated region fallthrough
CT: control target
= control target key end

     0   :  { %12 = vsyncpa [#allocation3], 0  ;;  %s602_s24 = smov [#allocation2]   ;;  %s838_s0 = inlined_call_operand.vmem [shape: f32[8,256], index: 0, kind: input, shape index: {}]   ;;  %s839_s1 = inlined_call_operand.vmem [shape: f32[256,128], index: 1, kind: input, shape index: {}]   ;;  %s840_s2 = inlined_call_operand.vmem [shape: f32[1,128], index: 2, kind: input, shape index: {}]   ;;  %s841_s3 = inlined_call_operand.hbm [shape: f32[128,128], index: 3, kind: input, shape index: {}]   ;;  %s842_s4 = inlined_call_operand.vmem [shape: f32[1,128], index: 4, kind: input, shape index: {}]   ;;  %s843_s5 = inlined_call_operand.vmem [shape: f32[128,4], index: 5, kind: input, shape index: {}]   ;;  %s844_s6 = inlined_call_operand.vmem [shape: f32[1,4], index: 6, kind: input, shape index: {}]   ;;  %s845_s7 = inlined_call_operand.vmem [shape: f32[8,4], index: 7, kind: output, shape index: {}]  }
   0x1   :  { %s24_s25 = sshll.u32 %s602_s24, 4  ;;  %s578_s28 = scalar_lea.hbm %s841_s3, 2048  ;;  %s25_s25 = int_to_ptr.vmem [resolvable:$true] %s24_s25 }
   0x2   :  { %p579_p0 = scmp.ne.s32.totalorder %s841_s3, %s578_s28  ;;  %p582_p1 = scmp.lt.u32.totalorder %s578_s28, %s841_s3 }
   0x4   :  { %p584_p2 = pnand %p582_p1, %p579_p0 }
   0x6   :  { %587 = shalt.err (!%p584_p2)
}
   0x7   :  { %s588_s10 = scalar_lea.vmem %s25_s25, 2048  ;;  %p593_p4 = scmp.lt.s32.totalorder %s25_s25, %s25_s25 }
   0x8   :  { %p589_p3 = scmp.ne.s32.totalorder %s25_s25, %s588_s10  ;;  %p594_p5 = scmp.lt.s32.totalorder %s588_s10, %s588_s10 }
   0xa   :  { %p595_p6 = por %p594_p5, %p593_p4 }
   0xc   :  { %p596_p7 = pnand %p595_p6, %p589_p3 }
   0xe   :  { %599 = shalt.err (!%p596_p7)
}
   0xf   :  { %s603_s11 = smov 128   ;;  %s604_s12 = smov 8  }
  0x10   :  { %30 = dma.hbm_to_vmem [thread:$0]  %s841_s3, 2048, %s25_s25, [#allocation3], %s603_s11, %s603_s11, %s604_s12  }
  0x11   :  { %600 = dma.done.wait [#allocation3], 2048  }
  0x12   :  { %601 = vsyncadd [#allocation3], 4294965248  ;;  %v605_v0 = vmov 0.0|0.0   ;;  %v58_v1 = vld [vmem:[%s839_s1 + $0x80] sm:$0xff]  ;;  %v59_v2 = vld [vmem:[%s839_s1 + $0x88] sm:$0xff]  ;;  %vm606_vm0 = vmmov 0  }
  0x13   :  { %520 = vmatprep.subr.bf16.mxu1 %v605_v0  ;;  %v42_v3 = vld [vmem:[%s839_s1] sm:$0xff]  ;;  %v488_v4 = vpack.c.bf16 %v59_v2, %v58_v1  ;;  %v43_v5 = vld [vmem:[%s839_s1 + $0x8] sm:$0xff]  ;;  %v60_v6 = vld [vmem:[%s839_s1 + $0x90] sm:$0xff]  ;;  %vm339_vm1 = vcmask 31744  }
  0x14   :  { %v61_v7 = vld [vmem:[%s839_s1 + $0x98] sm:$0xff]  ;;  %v490_v8 = vpack.c.bf16 %v43_v5, %v42_v3  ;;  %v44_v10 = vld [vmem:[%s839_s1 + $0x10] sm:$0xff]  ;;  %v62_v12 = vld [vmem:[%s839_s1 + $0xa0] sm:$0xff] }
  0x15   :  { %v492_v9 = vpack.c.bf16 %v61_v7, %v60_v6  ;;  %v45_v11 = vld [vmem:[%s839_s1 + $0x18] sm:$0xff]  ;;  %489 = vmatprep.subr.bf16.mxu0 %v488_v4  ;;  %v63_v13 = vld [vmem:[%s839_s1 + $0xa8] sm:$0xff]  ;;  %v46_v16 = vld [vmem:[%s839_s1 + $0x20] sm:$0xff] }
  0x16   :  { %491 = vmatpush3.bf16.msra.mxu0 %v490_v8  ;;  %v494_v14 = vpack.c.bf16 %v45_v11, %v44_v10  ;;  %v496_v15 = vpack.c.bf16 %v63_v13, %v62_v12  ;;  %v47_v17 = vld [vmem:[%s839_s1 + $0x28] sm:$0xff]  ;;  %v64_v18 = vld [vmem:[%s839_s1 + $0xb0] sm:$0xff]  ;;  %v65_v19 = vld [vmem:[%s839_s1 + $0xb8] sm:$0xff]  ;;  %v607_v11 = vmov 0.0  }
  0x17   :  { %493 = vmatprep.subr.bf16.mxu0 %v492_v9  ;;  %v498_v20 = vpack.c.bf16 %v47_v17, %v46_v16  ;;  %v500_v21 = vpack.c.bf16 %v65_v19, %v64_v18  ;;  %v48_v22 = vld [vmem:[%s839_s1 + $0x30] sm:$0xff]  ;;  %v49_v23 = vld [vmem:[%s839_s1 + $0x38] sm:$0xff]  ;;  %v66_v24 = vld [vmem:[%s839_s1 + $0xc0] sm:$0xff]  ;;  %450 = vmatprep.mubr.msk.f32.mxu1 %vm606_vm0, %v607_v11 }
  0x18   :  { %v67_v25 = vld [vmem:[%s839_s1 + $0xc8] sm:$0xff]  ;;  %v152_v27 = vld [vmem:[#allocation2] sm:$0xff]  ;;  %v502_v29 = vpack.c.bf16 %v49_v23, %v48_v22  ;;  %v154_v31 = vld [vmem:[#allocation2 + $0x10] sm:$0xff] }
  0x19   :  { %v41_v26 = vld [vmem:[%s838_s0 + $0x8] sm:$0xff]  ;;  %v155_v32 = vld [vmem:[#allocation2 + $0x18] sm:$0xff]  ;;  %v504_v33 = vpack.c.bf16 %v67_v25, %v66_v24  ;;  %v50_v34 = vld [vmem:[%s839_s1 + $0x40] sm:$0xff] }
  0x1a   :  { %495 = vmatpush3.bf16.msra.mxu0 %v494_v14  ;;  %145 = vmatprep.mubr.f32.mxu0 %v41_v26  ;;  %v153_v28 = vld [vmem:[#allocation2 + $0x8] sm:$0xff]  ;;  %v68_v36 = vld [vmem:[%s839_s1 + $0xd0] sm:$0xff]  ;;  %v69_v37 = vld [vmem:[%s839_s1 + $0xd8] sm:$0xff]  ;;  %v524_v38 = vpack.c.bf16 %v155_v32, %v154_v31 }
  0x1b   :  { %497 = vmatprep.subr.bf16.mxu0 %v496_v15  ;;  %v521_v30 = vpack.c.bf16 %v153_v28, %v152_v27  ;;  %v51_v35 = vld [vmem:[%s839_s1 + $0x48] sm:$0xff]  ;;  %v156_v39 = vld [vmem:[#allocation2 + $0x20] sm:$0xff]  ;;  %v508_v42 = vpack.c.bf16 %v69_v37, %v68_v36  ;;  %v52_v43 = vld [vmem:[%s839_s1 + $0x50] sm:$0xff] }
  0x1c   :  { %v157_v40 = vld [vmem:[#allocation2 + $0x28] sm:$0xff]  ;;  %v506_v41 = vpack.c.bf16 %v51_v35, %v50_v34  ;;  %v53_v44 = vld [vmem:[%s839_s1 + $0x58] sm:$0xff]  ;;  %v70_v45 = vld [vmem:[%s839_s1 + $0xe0] sm:$0xff] }
  0x1d   :  { %522 = vmatpush3.bf16.msra.mxu1 %v521_v30  ;;  %v71_v46 = vld [vmem:[%s839_s1 + $0xe8] sm:$0xff]  ;;  %v527_v47 = vpack.c.bf16 %v157_v40, %v156_v39  ;;  %v158_v48 = vld [vmem:[#allocation2 + $0x30] sm:$0xff]  ;;  %v159_v49 = vld [vmem:[#allocation2 + $0x38] sm:$0xff]  ;;  %v510_v50 = vpack.c.bf16 %v53_v44, %v52_v43 }
  0x1e   :  { %499 = vmatpush3.bf16.msra.mxu0 %v498_v20  ;;  %523 = vmatprep.subr.bf16.mxu1 %v605_v0  ;;  %v512_v51 = vpack.c.bf16 %v71_v46, %v70_v45  ;;  %v54_v52 = vld [vmem:[%s839_s1 + $0x60] sm:$0xff]  ;;  %v55_v53 = vld [vmem:[%s839_s1 + $0x68] sm:$0xff]  ;;  %v72_v54 = vld [vmem:[%s839_s1 + $0xf0] sm:$0xff]  ;;  %v530_v56 = vpack.c.bf16 %v159_v49, %v158_v48 }
  0x1f   :  { %501 = vmatprep.subr.bf16.mxu0 %v500_v21  ;;  %v73_v55 = vld [vmem:[%s839_s1 + $0xf8] sm:$0xff]  ;;  %v514_v57 = vpack.c.bf16 %v55_v53, %v54_v52  ;;  %v56_v59 = vld [vmem:[%s839_s1 + $0x70] sm:$0xff]  ;;  %v40_v62 = vld [vmem:[%s838_s0] sm:$0xff] }
  0x20   :  { %v516_v58 = vpack.c.bf16 %v73_v55, %v72_v54  ;;  %v57_v60 = vld [vmem:[%s839_s1 + $0x78] sm:$0xff]  ;;  %v160_v63 = vld [vmem:[#allocation2 + $0x40] sm:$0xff]  ;;  %v161_v1 = vld [vmem:[#allocation2 + $0x48] sm:$0xff] }
  0x21   :  { %525 = vmatpush3.bf16.msra.mxu1 %v524_v38  ;;  %v518_v61 = vpack.c.bf16 %v57_v60, %v56_v59  ;;  %v533_v2 = vpack.c.bf16 %v161_v1, %v160_v63  ;;  %v162_v3 = vld [vmem:[#allocation2 + $0x50] sm:$0xff]  ;;  %v163_v4 = vld [vmem:[#allocation2 + $0x58] sm:$0xff]  ;;  %v164_v6 = vld [vmem:[#allocation2 + $0x60] sm:$0xff] }
  0x22   :  { %503 = vmatpush3.bf16.msra.mxu0 %v502_v29  ;;  %526 = vmatprep.subr.bf16.mxu1 %v605_v0  ;;  %v536_v5 = vpack.c.bf16 %v163_v4, %v162_v3  ;;  %v165_v7 = vld [vmem:[#allocation2 + $0x68] sm:$0xff]  ;;  %v166_v9 = vld [vmem:[#allocation2 + $0x70] sm:$0xff]  ;;  %v167_v10 = vld [vmem:[#allocation2 + $0x78] sm:$0xff] }
  0x23   :  { %505 = vmatprep.subr.bf16.mxu0 %v504_v33  ;;  %v539_v8 = vpack.c.bf16 %v165_v7, %v164_v6  ;;  %v542_v12 = vpack.c.bf16 %v167_v10, %v166_v9  ;;  %v246_v13 = vld [vmem:[%s843_s5] sm:$0xff]  ;;  %v247_v14 = vld [vmem:[%s843_s5 + $0x8] sm:$0xff]  ;;  %v248_v15 = vld [vmem:[%s843_s5 + $0x10] sm:$0xff] }
  0x24   :  { %v545_v16 = vpack.c.bf16 %v247_v14, %v246_v13  ;;  %v249_v17 = vld [vmem:[%s843_s5 + $0x18] sm:$0xff]  ;;  %v250_v19 = vld [vmem:[%s843_s5 + $0x20] sm:$0xff]  ;;  %v251_v20 = vld [vmem:[%s843_s5 + $0x28] sm:$0xff] }
  0x25   :  { %528 = vmatpush3.bf16.msra.mxu1 %v527_v47  ;;  %v548_v18 = vpack.c.bf16 %v249_v17, %v248_v15  ;;  %v551_v21 = vpack.c.bf16 %v251_v20, %v250_v19  ;;  %v252_v22 = vld [vmem:[%s843_s5 + $0x30] sm:$0xff]  ;;  %v253_v23 = vld [vmem:[%s843_s5 + $0x38] sm:$0xff]  ;;  %v254_v25 = vld [vmem:[%s843_s5 + $0x40] sm:$0xff] }
  0x26   :  { %507 = vmatpush3.bf16.msra.mxu0 %v506_v41  ;;  %529 = vmatprep.subr.bf16.mxu1 %v605_v0  ;;  %v554_v24 = vpack.c.bf16 %v253_v23, %v252_v22  ;;  %v255_v26 = vld [vmem:[%s843_s5 + $0x48] sm:$0xff]  ;;  %v346_v29 = vld [vmem:[%s840_s2] ss:$0 sm:$0xff]  ;;  %v256_v34 = vld [vmem:[%s843_s5 + $0x50] sm:$0xff] }
  0x27   :  { %509 = vmatprep.subr.bf16.mxu0 %v508_v42  ;;  %v557_v27 = vpack.c.bf16 %v255_v26, %v254_v25  ;;  %v257_v35 = vld [vmem:[%s843_s5 + $0x58] sm:$0xff]  ;;  %v258_v37 = vld [vmem:[%s843_s5 + $0x60] sm:$0xff]  ;;  %v259_v38 = vld [vmem:[%s843_s5 + $0x68] sm:$0xff] }
  0x28   :  { %v560_v36 = vpack.c.bf16 %v257_v35, %v256_v34  ;;  %v563_v39 = vpack.c.bf16 %v259_v38, %v258_v37  ;;  %v260_v40 = vld [vmem:[%s843_s5 + $0x70] sm:$0xff]  ;;  %v261_v41 = vld [vmem:[%s843_s5 + $0x78] sm:$0xff]  ;;  %v347_v43 = vld [vmem:[%s842_s4] ss:$0 sm:$0xff] }
  0x29   :  { %531 = vmatpush3.bf16.msra.mxu1 %v530_v56  ;;  %v566_v42 = vpack.c.bf16 %v261_v41, %v260_v40  ;;  %v348_v48 = vld [vmem:[%s844_s6] ss:$0 sm:$0xff] }
  0x2a   :  { %511 = vmatpush3.bf16.msra.mxu0 %v510_v50  ;;  %532 = vmatprep.subr.bf16.mxu1 %v605_v0 }
  0x2b   :  { %513 = vmatprep.subr.bf16.mxu0 %v512_v51 }
  0x2d   :  { %534 = vmatpush3.bf16.msra.mxu1 %v533_v2 }
  0x2e   :  { %515 = vmatpush3.bf16.msra.mxu0 %v514_v57  ;;  %535 = vmatprep.subr.bf16.mxu1 %v605_v0 }
  0x2f   :  { %517 = vmatprep.subr.bf16.mxu0 %v516_v58 }
  0x31   :  { %537 = vmatpush3.bf16.msra.mxu1 %v536_v5 }
  0x32   :  { %519 = vmatpush3.bf16.msra.mxu0 %v518_v61  ;;  %538 = vmatprep.subr.bf16.mxu1 %v605_v0 }
  0x33   :  { %544 = vmatprep.subr.bf16.mxu0 %v605_v0 }
  0x35   :  { %146 = vmatmul.mubr.f32.vlgmr.msra.gmra.mrb[0].mxu0 %v40_v62  ;;  %540 = vmatpush3.bf16.msra.mxu1 %v539_v8 }
  0x36   :  { %485 = vmatprep.mubr.msk.f32.mxu0 %vm606_vm0, %v607_v11  ;;  %541 = vmatprep.subr.bf16.mxu1 %v605_v0 }
  0x37   :  { %546 = vmatpush3.bf16.msra.mxu0 %v545_v16 }
  0x38   :  { %547 = vmatprep.subr.bf16.mxu0 %v605_v0 }
  0x39   :  { %543 = vmatpush3.bf16.msra.mxu1 %v542_v12 }
  0x3b   :  { %549 = vmatpush3.bf16.msra.mxu0 %v548_v18 }
  0x3c   :  { %550 = vmatprep.subr.bf16.mxu0 %v605_v0 }
  0x3f   :  { %552 = vmatpush3.bf16.msra.mxu0 %v551_v21 }
  0x40   :  { %553 = vmatprep.subr.bf16.mxu0 %v605_v0 }
  0x43   :  { %555 = vmatpush3.bf16.msra.mxu0 %v554_v24 }
  0x44   :  { %556 = vmatprep.subr.bf16.mxu0 %v605_v0 }
  0x47   :  { %558 = vmatpush3.bf16.msra.mxu0 %v557_v27 }
  0x48   :  { %559 = vmatprep.subr.bf16.mxu0 %v605_v0 }
  0x4b   :  { %561 = vmatpush3.bf16.msra.mxu0 %v560_v36 }
  0x4c   :  { %562 = vmatprep.subr.bf16.mxu0 %v605_v0 }
  0x4f   :  { %564 = vmatpush3.bf16.msra.mxu0 %v563_v39 }
  0x50   :  { %565 = vmatprep.subr.bf16.mxu0 %v605_v0 }
  0x53   :  { %567 = vmatpush3.bf16.msra.mxu0 %v566_v42 }
 0x108   :  { %v381_v28 = vpop.f32.mrb[0].mxu0 }
 0x109   :  { %v382_v30 = vpop.f32.mrb[1].mxu0 }
 0x10a   :  { %v383_v31 = vadd.f32 %v382_v30, %v381_v28 }
 0x10c   :  { %v148_v32 = vadd.f32 %v383_v31, %v346_v29 }
 0x10e   :  { %574 = vtanh.f32 %v148_v32 }
 0x118   :  { %v575_v33 = vpop.eup %574 }
 0x119   :  { %451 = vmatmul.mubr.f32.vlgmr.msra.gmra.mrb[0].mxu1 %v575_v33 }
 0x1ec   :  { %v241_v44 = vpop.f32.mrb[0].mxu1 }
 0x1ed   :  { %v242_v45 = vadd.f32 %v347_v43, %v241_v44  ;;  %v452_v46 = vpop.f32.mrb[1].mxu1 }
 0x1ef   :  { %576 = vtanh.f32 %v242_v45 }
 0x1f9   :  { %v577_v47 = vpop.eup %576 }
 0x1fa   :  { %486 = vmatmul.mubr.f32.vlgmr.msra.gmra.mrb[2].mxu0 %v577_v47 }
 0x2cd   :  { %v335_v49 = vpop.f32.mrb[2].mxu0 }
 0x2ce   :  { %v336_v50 = vadd.f32 %v348_v48, %v335_v49  ;;  %v487_v51 = vpop.f32.mrb[3].mxu0 }
 0x2d0   :  { %340 = vst.msk [vmem:[%s845_s7] sm:$0xff] %vm339_vm1, %v336_v50 }
 0x2d1   :  { %345 = vsyncpa [#allocation3], 1 }

</bundles_post_ra>
